<compile_context>
chip_gen: v5e
topology: v5e:2x2
jax: 0.10.0
libtpu: 0.0.40
codegen_flags: <defaults>
</compile_context>

<pallas_src>
import jax
import jax.numpy as jnp
from jax.experimental import pallas as pl
from jax.experimental.pallas import tpu as pltpu

CONTEXT_DIM = 6


def _make_kernel(xt_dim: int, ctx_dim: int):
    """Kernel: out = [SiLU-MLP([x | t]), zeros(ctx_dim)] for one batch tile."""

    def kernel(t_ref, x_ref, w1x_ref, w1t_ref, b1_ref, w2_ref, b2_ref, out_ref):
        # t_ref  : (1, 1) SMEM scalar flow time
        # x_ref  : (TILE_B, D)  with D = xt_dim + ctx_dim  ([xt | context])
        # w1x_ref: (D, H), w1t_ref: (1, H), b1_ref: (1, H)
        # w2_ref : (H, xt_dim), b2_ref: (1, xt_dim)
        # out_ref: (TILE_B, D)
        t = t_ref[0, 0]
        x = x_ref[...]

        # h = [x | t] @ W1 + b1  ==  x @ W1[:D] + t * W1[D] + b1
        h = jnp.dot(x, w1x_ref[...], preferred_element_type=jnp.float32)
        h = h + t * w1t_ref[...] + b1_ref[...]
        h = h * jax.nn.sigmoid(h)  # SiLU, kept in f32

        dxt = jnp.dot(h, w2_ref[...], preferred_element_type=jnp.float32)
        dxt = dxt + b2_ref[...]

        # dx_dt = cat([dxt_dt, zeros_like(context)], -1) via slice stores
        # (no lane-axis concatenate inside the kernel).
        out_ref[...] = jnp.zeros(out_ref.shape, out_ref.dtype)
        out_ref[:, :xt_dim] = dxt.astype(out_ref.dtype)

    return kernel


def init_base_model_params(key, in_dim: int, hidden: int, out_dim: int):
    """Deterministic synthetic base-model (2-layer MLP) parameters."""
    k1, k2, k3, k4 = jax.random.split(key, 4)
    s1 = 1.0 / jnp.sqrt(jnp.float32(in_dim))
    s2 = 1.0 / jnp.sqrt(jnp.float32(hidden))
    w1 = jax.random.uniform(k1, (in_dim, hidden), jnp.float32, -s1, s1)
    b1 = jax.random.uniform(k2, (1, hidden), jnp.float32, -s1, s1)
    w2 = jax.random.uniform(k3, (hidden, out_dim), jnp.float32, -s2, s2)
    b2 = jax.random.uniform(k4, (1, out_dim), jnp.float32, -s2, s2)
    return w1, b1, w2, b2


def model_wrapper_forward(t, x, params, context_dim: int = CONTEXT_DIM,
                          tile_b: int | None = None):
    """
    JAX/Pallas equivalent of ModelWrapper.forward.

    Args:
      t: scalar (or (1,)/(1,1)) flow time, float32.
      x: (B, D) float32, D = xt_dim + context_dim, layout [xt | context].
      params: (w1, b1, w2, b2) of the synthetic base model; w1 has D+1 rows
              (the last row is the flow-time column).
      tile_b: batch tile size (multiple of 8). Defaults to min(B, 256), which
              stays well under the 32 MiB scoped-VMEM default on v7x.

    Returns:
      dx_dt: (B, D) float32, last `context_dim` columns are zero.
    """
    w1, b1, w2, b2 = params
    B, D = x.shape
    xt_dim = D - context_dim
    H = w1.shape[1]
    assert w1.shape[0] == D + 1, "w1 must have rows for [xt | context | t]"

    # Static split of the first layer: [x]-rows vs. the flow-time row. These
    # are trace-time slices of the weights (done once), not per-call glue.
    w1_x = w1[:D, :]
    w1_t = w1[D:D + 1, :]
    t_smem = jnp.reshape(t, (1, 1)).astype(jnp.float32)

    if tile_b is None:
        tile_b = min(B, 256)
    n_tiles = pl.cdiv(B, tile_b)
    b_pad = n_tiles * tile_b
    x_in = x if b_pad == B else jnp.pad(x, ((0, b_pad - B), (0, 0)))

    kernel = _make_kernel(xt_dim, context_dim)
    out = pl.pallas_call(
        kernel,
        out_shape=jax.ShapeDtypeStruct((b_pad, D), x.dtype),
        grid=(n_tiles,),
        in_specs=[
            pl.BlockSpec((1, 1), lambda i: (0, 0),
                         memory_space=pltpu.MemorySpace.SMEM),     # t (scalar)
            pl.BlockSpec((tile_b, D), lambda i: (i, 0)),           # x tile
            pl.BlockSpec((D, H), lambda i: (0, 0)),                # w1_x (resident)
            pl.BlockSpec((1, H), lambda i: (0, 0)),                # w1_t (resident)
            pl.BlockSpec((1, H), lambda i: (0, 0)),                # b1   (resident)
            pl.BlockSpec((H, xt_dim), lambda i: (0, 0)),           # w2   (resident)
            pl.BlockSpec((1, xt_dim), lambda i: (0, 0)),           # b2   (resident)
        ],
        out_specs=pl.BlockSpec((tile_b, D), lambda i: (i, 0)),
        compiler_params=pltpu.CompilerParams(
            dimension_semantics=("parallel",)),
    )(t_smem, x_in, w1_x, w1_t, b1, w2, b2)

    return out[:B] if b_pad != B else out


def _reference_forward(t, x, params, context_dim: int = CONTEXT_DIM):
    """Pure-JAX reference matching the original PyTorch semantics."""
    w1, b1, w2, b2 = params
    B, D = x.shape
    t_b = jnp.broadcast_to(jnp.reshape(t, (1, 1)), (B, 1)).astype(x.dtype)
    inp = jnp.concatenate([x, t_b], axis=-1)          # [xt | context | t]
    h = inp @ w1 + b1
    h = h * jax.nn.sigmoid(h)
    dxt = h @ w2 + b2
    zeros_ctx = jnp.zeros((B, context_dim), x.dtype)
    return jnp.concatenate([dxt, zeros_ctx], axis=-1)


if __name__ == "__main__":
    key = jax.random.PRNGKey(0)
    k_x, k_t, k_p = jax.random.split(key, 3)

    B = 32          # batch (small demo; tile_b=8 -> grid of 4 pipelined tiles)
    XT_DIM = 32     # evolving part of the state
    HIDDEN = 128    # lane-dense hidden width of the synthetic base model
    D = XT_DIM + CONTEXT_DIM
    D_IN = D + 1    # [xt | context | flow_time]

    x = jax.random.normal(k_x, (B, D), dtype=jnp.float32)
    t = jax.random.uniform(k_t, (), dtype=jnp.float32)
    params = init_base_model_params(k_p, D_IN, HIDDEN, XT_DIM)

    out = model_wrapper_forward(t, x, params, tile_b=8)
    out = jax.block_until_ready(out)

    ref = _reference_forward(t, x, params)
    assert out.shape == (B, D)
    assert jnp.allclose(out[:, -CONTEXT_DIM:], 0.0)
    assert jnp.allclose(out, ref, atol=1e-5, rtol=1e-5)

    print("KERNEL_OK")
</pallas_src>

<mosaic_0001>
module attributes {stable_mosaic.version = 11 : i64} {
  func.func @kernel(%arg0: i32, %arg1: memref<1x1xf32, #tpu.memory_space<smem>>, %arg2: memref<8x38xf32, #tpu.memory_space<vmem>>, %arg3: memref<38x128xf32, #tpu.memory_space<vmem>>, %arg4: memref<1x128xf32, #tpu.memory_space<vmem>>, %arg5: memref<1x128xf32, #tpu.memory_space<vmem>>, %arg6: memref<128x32xf32, #tpu.memory_space<vmem>>, %arg7: memref<1x32xf32, #tpu.memory_space<vmem>>, %arg8: memref<8x38xf32, #tpu.memory_space<vmem>>) attributes {dimension_semantics = [#tpu.dimension_semantics<parallel>], iteration_bounds = array<i64: 4>, scalar_prefetch = 0 : i64, scratch_operands = 0 : i64, tpu.core_type = #tpu.core_type<tc>, window_params = [{transform_indices = @transform_0, window_bounds = array<i64: 1, 1>}, {transform_indices = @transform_1, window_bounds = array<i64: 8, 38>}, {pipeline_mode = #tpu.pipeline_mode<synchronous>, transform_indices = @transform_2, window_bounds = array<i64: 38, 128>}, {pipeline_mode = #tpu.pipeline_mode<synchronous>, transform_indices = @transform_3, window_bounds = array<i64: 1, 128>}, {pipeline_mode = #tpu.pipeline_mode<synchronous>, transform_indices = @transform_4, window_bounds = array<i64: 1, 128>}, {pipeline_mode = #tpu.pipeline_mode<synchronous>, transform_indices = @transform_5, window_bounds = array<i64: 128, 32>}, {pipeline_mode = #tpu.pipeline_mode<synchronous>, transform_indices = @transform_6, window_bounds = array<i64: 1, 32>}, {transform_indices = @transform_7, window_bounds = array<i64: 8, 38>}]} {
    %c0 = arith.constant 0 : index
    %c0_0 = arith.constant 0 : index
    %0 = memref.load %arg1[%c0, %c0_0] : memref<1x1xf32, #tpu.memory_space<smem>>
    %c0_1 = arith.constant 0 : index
    %c0_2 = arith.constant 0 : index
    %1 = vector.load %arg2[%c0_1, %c0_2] : memref<8x38xf32, #tpu.memory_space<vmem>>, vector<8x38xf32>
    %c0_3 = arith.constant 0 : index
    %c0_4 = arith.constant 0 : index
    %2 = vector.load %arg3[%c0_3, %c0_4] : memref<38x128xf32, #tpu.memory_space<vmem>>, vector<38x128xf32>
    %cst = arith.constant dense<0.000000e+00> : vector<8x128xf32>
    %3 = tpu.matmul %1, %2, %cst {dimension_numbers = #tpu.dot_dimension_numbers<[1], [0], [0], [1], [0, 0, 1, 1], [], []>} : vector<8x38xf32>, vector<38x128xf32>, vector<8x128xf32> -> vector<8x128xf32>
    %c0_5 = arith.constant 0 : index
    %c0_6 = arith.constant 0 : index
    %4 = vector.load %arg4[%c0_5, %c0_6] : memref<1x128xf32, #tpu.memory_space<vmem>>, vector<1x128xf32>
    %5 = vector.broadcast %0 : f32 to vector<1x128xf32>
    %6 = arith.mulf %5, %4 : vector<1x128xf32>
    %7 = vector.broadcast %6 : vector<1x128xf32> to vector<8x128xf32>
    %8 = arith.addf %3, %7 : vector<8x128xf32>
    %c0_7 = arith.constant 0 : index
    %c0_8 = arith.constant 0 : index
    %9 = vector.load %arg5[%c0_7, %c0_8] : memref<1x128xf32, #tpu.memory_space<vmem>>, vector<1x128xf32>
    %10 = vector.broadcast %9 : vector<1x128xf32> to vector<8x128xf32>
    %11 = arith.addf %8, %10 : vector<8x128xf32>
    %12 = arith.negf %11 : vector<8x128xf32>
    %13 = math.exp %12 : vector<8x128xf32>
    %cst_9 = arith.constant 1.000000e+00 : f32
    %14 = vector.broadcast %cst_9 : f32 to vector<8x128xf32>
    %15 = arith.addf %14, %13 : vector<8x128xf32>
    %16 = arith.divf %14, %15 : vector<8x128xf32>
    %17 = arith.mulf %11, %16 : vector<8x128xf32>
    %c0_10 = arith.constant 0 : index
    %c0_11 = arith.constant 0 : index
    %18 = vector.load %arg6[%c0_10, %c0_11] : memref<128x32xf32, #tpu.memory_space<vmem>>, vector<128x32xf32>
    %cst_12 = arith.constant dense<0.000000e+00> : vector<8x32xf32>
    %19 = tpu.matmul %17, %18, %cst_12 {dimension_numbers = #tpu.dot_dimension_numbers<[1], [0], [0], [1], [0, 0, 1, 1], [], []>} : vector<8x128xf32>, vector<128x32xf32>, vector<8x32xf32> -> vector<8x32xf32>
    %c0_13 = arith.constant 0 : index
    %c0_14 = arith.constant 0 : index
    %20 = vector.load %arg7[%c0_13, %c0_14] : memref<1x32xf32, #tpu.memory_space<vmem>>, vector<1x32xf32>
    %21 = vector.broadcast %20 : vector<1x32xf32> to vector<8x32xf32>
    %22 = arith.addf %19, %21 : vector<8x32xf32>
    %cst_15 = arith.constant 0.000000e+00 : f32
    %23 = vector.broadcast %cst_15 : f32 to vector<8x38xf32>
    %c0_16 = arith.constant 0 : index
    %c0_17 = arith.constant 0 : index
    %24 = vector.load %arg8[%c0_16, %c0_17] : memref<8x38xf32, #tpu.memory_space<vmem>>, vector<8x38xf32>
    tpu.vector_store %arg8[%c0_16, %c0_17], %23 {strides = array<i32>} : memref<8x38xf32, #tpu.memory_space<vmem>>, vector<8x38xf32>,
    %c0_18 = arith.constant 0 : index
    %c0_19 = arith.constant 0 : index
    %25 = vector.load %arg8[%c0_18, %c0_19] : memref<8x38xf32, #tpu.memory_space<vmem>>, vector<8x32xf32>
    tpu.vector_store %arg8[%c0_18, %c0_19], %22 {strides = array<i32>} : memref<8x38xf32, #tpu.memory_space<vmem>>, vector<8x32xf32>,
    return
  }
  func.func @transform_0(%arg0: i32) -> (i32, i32) {
    %c0_i32 = arith.constant 0 : i32
    %c0_i32_0 = arith.constant 0 : i32
    %c0_i32_1 = arith.constant 0 : i32
    return %c0_i32, %c0_i32_0 : i32, i32
  }
  func.func @transform_1(%arg0: i32) -> (i32, i32) {
    %c0_i32 = arith.constant 0 : i32
    %c0_i32_0 = arith.constant 0 : i32
    return %arg0, %c0_i32 : i32, i32
  }
  func.func @transform_2(%arg0: i32) -> (i32, i32) {
    %c0_i32 = arith.constant 0 : i32
    %c0_i32_0 = arith.constant 0 : i32
    %c0_i32_1 = arith.constant 0 : i32
    return %c0_i32, %c0_i32_0 : i32, i32
  }
  func.func @transform_3(%arg0: i32) -> (i32, i32) {
    %c0_i32 = arith.constant 0 : i32
    %c0_i32_0 = arith.constant 0 : i32
    %c0_i32_1 = arith.constant 0 : i32
    return %c0_i32, %c0_i32_0 : i32, i32
  }
  func.func @transform_4(%arg0: i32) -> (i32, i32) {
    %c0_i32 = arith.constant 0 : i32
    %c0_i32_0 = arith.constant 0 : i32
    %c0_i32_1 = arith.constant 0 : i32
    return %c0_i32, %c0_i32_0 : i32, i32
  }
  func.func @transform_5(%arg0: i32) -> (i32, i32) {
    %c0_i32 = arith.constant 0 : i32
    %c0_i32_0 = arith.constant 0 : i32
    %c0_i32_1 = arith.constant 0 : i32
    return %c0_i32, %c0_i32_0 : i32, i32
  }
  func.func @transform_6(%arg0: i32) -> (i32, i32) {
    %c0_i32 = arith.constant 0 : i32
    %c0_i32_0 = arith.constant 0 : i32
    %c0_i32_1 = arith.constant 0 : i32
    return %c0_i32, %c0_i32_0 : i32, i32
  }
  func.func @transform_7(%arg0: i32) -> (i32, i32) {
    %c0_i32 = arith.constant 0 : i32
    %c0_i32_0 = arith.constant 0 : i32
    return %arg0, %c0_i32 : i32, i32
  }
}

</mosaic_0001>

<bundles_post_ra>
// kernel: tpu_custom_call.1
= control target key start
LH: loop header
LB: loop body
LE: loop exit
PB: predicated region body
PF: predicated region fallthrough
CT: control target
= control target key end

     0   :  { %s792_s0 = inlined_call_operand.<no memory space> [shape: f32[1,1], index: 0, kind: input, shape index: {}]   ;;  %s793_s1 = inlined_call_operand.vmem [shape: f32[32,38], index: 1, kind: input, shape index: {}]   ;;  %s794_s2 = inlined_call_operand.vmem [shape: f32[38,128], index: 2, kind: input, shape index: {}]   ;;  %s795_s3 = inlined_call_operand.vmem [shape: f32[1,128], index: 3, kind: input, shape index: {}]   ;;  %s796_s4 = inlined_call_operand.vmem [shape: f32[1,128], index: 4, kind: input, shape index: {}]   ;;  %s797_s5 = inlined_call_operand.vmem [shape: f32[128,32], index: 5, kind: input, shape index: {}]   ;;  %s798_s6 = inlined_call_operand.vmem [shape: f32[1,32], index: 6, kind: input, shape index: {}]   ;;  %s799_s7 = inlined_call_operand.hbm [shape: f32[32,38], index: 7, kind: output, shape index: {}]  }
   0x1   :  { %12 = sst [smem:[#allocation2]] %s792_s0 }
   0x2   :  { %13 = vsyncpa [#allocation4], 0 }
   0x3   :  { %15 = vsyncpa [#allocation4 + $0x1], 0  ;;  %s626_s26 = smov 0   ;;  %s628_s27 = smov 0  }
   0x4   :  { %s630_s28 = smov 0   ;;  %s632_s29 = smov 0  }
   0x5 LB: > { %s647_s0 = sadd.s32 4294967295, %s580_s29   ;;  %s459_s30 = sadd.s32 4294967294, %s580_s29   ;;  %s580_s29 = sphi %s632_s29, %s805_s29   ;;  %s576_s28 = sphi %s630_s28, %s804_s28   ;;  %s572_s27 = sphi %s628_s27, %s803_s27   ;;  %s568_s26 = sphi %s626_s26, %s802_s26  }
   0x6   : > { %s651_s8 = sadd.s32 1, %s580_s29   ;;  %s180_s9 = sadd.s32 1, %s576_s28 }
   0x7   : > { %s177_s10 = ssub.s32 %s580_s29, %s651_s8  ;;  %p190_p0 = scmp.ne.s32.totalorder %s576_s28, %s572_s27 }
   0x8   : > { %p178_p1 = scmp.eq.s32.totalorder %s177_s10, 0  ;;  %p191_p2 = scmp.eq.s32.totalorder %s647_s0, 3 }
   0x9   : > { %p196_p3 = scmp.ne.s32.totalorder %s572_s27, %s568_s26  ;;  %p197_p4 = scmp.eq.s32.totalorder %s459_s30, 3 }
   0xa   : > { %s662_s11 = scalar_select %p178_p1, %s576_s28, %s180_s9  }
   0xb   : > { %p664_p5 = por %p191_p2, %p190_p0  ;;  %p668_p6 = por %p197_p4, %p196_p3 }
   0xc   : > { %p462_p7 = scmp.ge.s32.totalorder %s580_s29, 1  ;;  %p240_p8 = scmp.lt.s32.totalorder %s580_s29, 5 }
   0xe   : > { %p241_p9 = pnand %p462_p7, %p240_p8 }
   0xf   : > { %s268_s18 = sand.u32 (!%p241_p9), 1, %s572_s27   ;;  %p271_p10 = scmp.lt.s32.totalorder (!%p241_p9), %s647_s0, 3 }
  0x10   : > { %244 = sbr.rel (%p241_p9) target bundleno = 322 (0x142), region = 48  ;;  %s463_s19 = sshll.u32 (!%p241_p9), %s268_s18, 3 }
  0x11   : > { %s688_s23 = scalar_lea.vmem (!%p241_p9), [#allocation3], %s463_s19  ;;  %s469_s15 = sshll.u32 (!%p241_p9), %s647_s0, 3 }
  0x12   : > { %s395_s20 = scalar_lea.hbm (!%p241_p9), %s799_s7, %s469_s15  ;;  %s397_s24 = sshll.u32 (!%p241_p9), %s688_s23, 4  ;;  %s398_s24 = int_to_ptr.vmem [resolvable:$true] %s397_s24 }
  0x13   : > { %s399_s25 = sshll.u32 (!%p241_p9), %s395_s20, 4  ;;  %s538_s14 = scalar_lea.hbm (!%p241_p9), %s799_s7, 32  ;;  %s400_s25 = int_to_ptr.hbm [resolvable:$true] %s399_s25 }
  0x15   : > { %v281_v0 = vld [vmem:[%s794_s2 + $0x20] sm:$0x3f]  ;;  %vm292_vm0 = vcmask 1045504   ;;  %v280_v1 = vld [vmem:[%s794_s2 + $0x18] sm:$0xff]  ;;  %v279_v2 = vld [vmem:[%s794_s2 + $0x10] sm:$0xff]  ;;  %vm288_vm1 = vcmask 310272  }
  0x16   : > { %465 = vmatpush.msk.msra.mxu0 %vm292_vm0, %v281_v0  ;;  %s272_s22 = scalar_select %p271_p10, %s647_s0, 3  ;;  %v582_v3 = vmov 0.0   ;;  %v278_v4 = vld [vmem:[%s794_s2 + $0x8] sm:$0xff]  ;;  %v277_v5 = vld [vmem:[%s794_s2] sm:$0xff]  ;;  %v356_v7 = vld [vmem:[%s797_s5 + $0x78] sm:$0xff]  ;;  %vm382_vm6 = vcmask 261120  }
  0x17   : > { %381 = vst.msk [vmem:[%s688_s23] sm:$0xff] %vm288_vm1, %v582_v3  ;;  %361 = vmatpush.msra.mxu1 %v356_v7  ;;  %v355_v8 = vld [vmem:[%s797_s5 + $0x70] sm:$0xff]  ;;  %v354_v9 = vld [vmem:[%s797_s5 + $0x68] sm:$0xff]  ;;  %v353_v10 = vld [vmem:[%s797_s5 + $0x60] sm:$0xff]  ;;  %s532_s0 = sshra.s32 %s400_s25, 4  ;;  %s533_s0 = int_to_ptr.hbm [resolvable:$true] %s532_s0 }
  0x18   : > { %308 = vmatpush.msra.mxu0 %v280_v1  ;;  %s464_s30 = sshll.u32 %s272_s22, 3  ;;  %v352_v11 = vld [vmem:[%s797_s5 + $0x58] sm:$0xff]  ;;  %v351_v12 = vld [vmem:[%s797_s5 + $0x50] sm:$0xff]  ;;  %v350_v13 = vld [vmem:[%s797_s5 + $0x48] sm:$0xff]  ;;  %p539_p0 = scmp.lt.s32.totalorder %s533_s0, %s799_s7 }
  0x19   : > { %s274_s16 = scalar_lea.vmem %s793_s1, %s464_s30  ;;  %362 = vmatpush.msra.mxu1 %v355_v8  ;;  %v349_v14 = vld [vmem:[%s797_s5 + $0x40] sm:$0xff]  ;;  %v348_v15 = vld [vmem:[%s797_s5 + $0x38] sm:$0xff]  ;;  %v347_v16 = vld [vmem:[%s797_s5 + $0x30] sm:$0xff]  ;;  %s534_s30 = scalar_lea.hbm %s533_s0, 8 }
  0x1a   : > { %309 = vmatpush.msra.mxu0 %v279_v2  ;;  %v276_v6 = vld [vmem:[%s274_s16] sm:$0xff]  ;;  %s275_s16 = sld [smem:[#allocation2]]  ;;  %v346_v17 = vld [vmem:[%s797_s5 + $0x28] sm:$0xff]  ;;  %v344_v22 = vld [vmem:[%s797_s5 + $0x18] sm:$0xff]  ;;  %p535_p11 = scmp.ne.s32.totalorder %s533_s0, %s534_s30 }
  0x1b   : > { %363 = vmatpush.msra.mxu1 %v354_v9  ;;  %v282_v18 = vld [vmem:[%s795_s3] sm:$0x1]  ;;  %v343_v23 = vld [vmem:[%s797_s5 + $0x10] sm:$0xff]  ;;  %v342_v25 = vld [vmem:[%s797_s5 + $0x8] sm:$0xff]  ;;  %p540_p1 = scmp.lt.s32.totalorder %s538_s14, %s534_s30 }
  0x1c   : > { %310 = vmatpush.msra.mxu0 %v278_v4  ;;  %v345_v20 = vld [vmem:[%s797_s5 + $0x20] sm:$0xff]  ;;  %p536_p12 = pnand %p535_p11, %p664_p5 }
  0x1d   : > { %364 = vmatpush.msra.mxu1 %v353_v10  ;;  %v512_v26 = vld [vmem:[%s796_s4] ss:$0 sm:$0xff]  ;;  %p541_p2 = por %p540_p1, %p539_p0 }
  0x1e   : > { %311 = vmatpush.msra.mxu0 %v277_v5  ;;  %v341_v27 = vld [vmem:[%s797_s5] sm:$0xff]  ;;  %p537_p13 = pneg %p536_p12 }
  0x1f   : > { %466 = vmatmul.msk.f32.vlgmr.msra.gmra.mxu0 %vm288_vm1, %v276_v6  ;;  %365 = vmatpush.msra.mxu1 %v352_v11  ;;  %v513_v45 = vld [vmem:[%s798_s6] ss:$0 sm:$0xff] }
  0x20   : > { %v283_v19 = vstv %s275_s16  ;;  %s385_s16 = scalar_lea.sflag [#allocation4], %s268_s18  ;;  %p542_p3 = pnand %p541_p2, %p537_p13 }
  0x21   : > { %366 = vmatpush.msra.mxu1 %v351_v12  ;;  %v284_v21 = vmul.f32 %v283_v19, %v282_v18 }
  0x23   : > { %367 = vmatpush.msra.mxu1 %v350_v13  ;;  %v286_v24 = vperm.slane %v284_v21, 0 }
  0x25   : > { %368 = vmatpush.msra.mxu1 %v349_v14 }
  0x27   : > { %369 = vmatpush.msra.mxu1 %v348_v15 }
  0x29   : > { %370 = vmatpush.msra.mxu1 %v347_v16 }
  0x2b   : > { %371 = vmatpush.msra.mxu1 %v346_v17 }
  0x2d   : > { %372 = vmatpush.msra.mxu1 %v345_v20 }
  0x2f   : > { %373 = vmatpush.msra.mxu1 %v344_v22 }
  0x31   : > { %374 = vmatpush.msra.mxu1 %v343_v23 }
  0x33   : > { %375 = vmatpush.msra.mxu1 %v342_v25 }
  0x35   : > { %376 = vmatpush.msra.mxu1 %v341_v27 }
  0x9c   : > { %v313_v28 = vpop.f32.mrf.mxu0 }
  0x9d   : > { %v314_v29 = vadd.f32 %v313_v28, %v286_v24 }
  0x9f   : > { %v320_v30 = vadd.f32 %v512_v26, %v314_v29 }
  0xa1   : > { %v467_v31 = vmul.f32 -1.442695, %v320_v30 }
  0xa3   : > { %514 = vpow2.f32 %v467_v31 }
  0xa9   : > { %v515_v32 = vpop.eup %514 }
  0xaa   : > { %v324_v33 = vadd.f32 1.0, %v515_v32 }
  0xac   : > { %516 = vrcp.f32 %v324_v33  ;;  %v336_v37 = vand.u32 2147483648, %v324_v33  ;;  %v334_v39 = vand.u32 2147483647, %v324_v33  ;;  %vm330_vm3 = vweird.f32 %v324_v33 }
  0xae   : > { %v337_v41 = vor.u32 1.1754944e-38, %v336_v37  ;;  %vm335_vm5 = vcmp.eq.f32.partialorder %v334_v39, 8.507059e+37 }
  0xb2   : > { %v517_v34 = vpop.eup %516 }
  0xb3   : > { %v326_v35 = vmul.f32 %v517_v34, %v324_v33  ;;  %vm331_vm2 = vweird.f32 %v517_v34 }
  0xb4   : > { %vm332_vm4 = vmor %vm330_vm3, %vm331_vm2 }
  0xb5   : > { %v327_v36 = vsub.f32 1.0, %v326_v35 }
  0xb7   : > { %v328_v38 = vmul.f32 %v517_v34, %v327_v36 }
  0xb9   : > { %v329_v40 = vadd.f32 %v517_v34, %v328_v38 }
  0xbb   : > { %v333_v42 = vsel %vm332_vm4, %v517_v34, %v329_v40 }
  0xbc   : > { %v338_v43 = vsel %vm335_vm5, %v337_v41, %v333_v42 }
  0xbd   : > { %v340_v44 = vmul.f32 %v338_v43, %v320_v30 }
  0xbf   : > { %377 = vmatmul.f32.vlgmr.msra.gmra.mxu1 %v340_v44 }
 0x13c   : > { %v378_v46 = vpop.f32.mrf.mxu1 }
 0x13d   : > { %v379_v47 = vadd.f32 %v513_v45, %v378_v46 }
 0x13f   : > { %383 = vst.msk [vmem:[%s688_s23] sm:$0xff] %vm382_vm6, %v379_v47 }
 0x140   : > { %545 = shalt.err (!%p542_p3)
}
 0x141   : > { %472 = dma.vmem_to_hbm [thread:$0]  (%p664_p5), %s398_s24, 128, %s400_s25, %s385_s16  }
 0x142 PF: > { %p478_p4 = scmp.ge.s32.totalorder %s580_s29, 2  ;;  %s411_s18 = sand.u32 1, %s568_s26  }
 0x143   : > { %s412_s23 = scalar_lea.sflag [#allocation4], %s411_s18 }
 0x144   : > { %p475_p7 = pnand %p478_p4, %p668_p6 }
 0x146   : > { %p476_p8 = pneg %p475_p7 }
 0x148   : > { %563 = dma.done.wait (%p476_p8), %s412_s23, 128  }
 0x149   : > { %565 = vsyncadd (%p476_p8), %s412_s23, 4294967168  ;;  %p18_p9 = scmp.ge.s32.totalorder %s651_s8, 6   ;;  %s802_s26 = smov %s572_s27 }
 0x14a   : > { %s803_s27 = smov %s576_s28  ;;  %s804_s28 = smov %s662_s11 }
 0x14b   : > { %s805_s29 = smov %s651_s8  ;;  %20 = sbr.rel (!%p18_p9) target bundleno = 5 (0x5), region = 83 }
 0x150   :  { %418 = vsyncpa [#allocation4], 1 }
 0x151   :  { %420 = vsyncpa [#allocation4 + $0x1], 1 }

</bundles_post_ra>
